<compile_context>
chip_gen: v5e
topology: v5e:2x2
jax: 0.10.0
libtpu: 0.0.40
codegen_flags: <defaults>
</compile_context>

<pallas_src>
import jax
import jax.numpy as jnp
from jax.experimental import pallas as pl
from jax.experimental.pallas import tpu as pltpu

LANE = 128  # lane width: pad all feature dims to a multiple of this


def _round_up(n, m):
    return ((n + m - 1) // m) * m


def _pad2(a, rows, cols):
    return jnp.pad(a, ((0, rows - a.shape[0]), (0, cols - a.shape[1])))


def user_embedding_kernel(x_ref, w1_ref, b1_ref, w2_ref, b2_ref, w3_ref, b3_ref, o_ref):
    """One batch tile: 3 fused matmuls + tanh, all operands VMEM-resident."""
    mxu_dtype = w1_ref.dtype  # f32 or bf16 operands; accumulation is always f32

    x = x_ref[...]
    # layer1 + tanh (dropout1 = identity in eval mode)
    z1 = jnp.dot(x, w1_ref[...], preferred_element_type=jnp.float32) + b1_ref[...]
    h1 = jnp.tanh(z1)  # f32 tanh -> EUP path valid on v5e/v6e/v7x
    # layer2 + tanh (dropout2 = identity in eval mode)
    z2 = jnp.dot(h1.astype(mxu_dtype), w2_ref[...],
                 preferred_element_type=jnp.float32) + b2_ref[...]
    h2 = jnp.tanh(z2)
    # output_layer (no activation)
    out = jnp.dot(h2.astype(mxu_dtype), w3_ref[...],
                  preferred_element_type=jnp.float32) + b3_ref[...]
    o_ref[...] = out.astype(o_ref.dtype)


def user_embedding_forward(x, params, *, use_bf16=False, tm_max=512):
    """x: (B, input_size) float32. params: dict of (in,out) weights & (1,out) biases.

    Pads feature dims to 128 lanes and the batch to the tile size, runs a
    batch-tiled Pallas kernel, and slices the valid region back out.
    (In production, pad/cast the params once outside the call, not per call.)
    """
    w1, b1, w2, b2, w3, b3 = (
        params["w1"], params["b1"], params["w2"],
        params["b2"], params["w3"], params["b3"],
    )
    B, in_size = x.shape
    hidden = w1.shape[1]
    out_size = w3.shape[1]

    # Lane-dense padded feature dims.
    Kp = _round_up(in_size, LANE)
    Hp = _round_up(hidden, LANE)
    Op = _round_up(out_size, LANE)

    # Batch tiling: tile rows (multiple of 8 sublanes), pad B up to the grid.
    tm = min(tm_max, _round_up(B, 8))
    b_pad = _round_up(B, tm)
    grid = (pl.cdiv(b_pad, tm),)

    mxu_dtype = jnp.bfloat16 if use_bf16 else x.dtype
    x_p = _pad2(x, b_pad, Kp).astype(mxu_dtype)
    w1_p = _pad2(w1, Kp, Hp).astype(mxu_dtype)
    w2_p = _pad2(w2, Hp, Hp).astype(mxu_dtype)
    w3_p = _pad2(w3, Hp, Op).astype(mxu_dtype)
    # Biases stay f32: they add onto the f32 accumulator.
    b1_p = _pad2(b1, 1, Hp).astype(jnp.float32)
    b2_p = _pad2(b2, 1, Hp).astype(jnp.float32)
    b3_p = _pad2(b3, 1, Op).astype(jnp.float32)

    const = lambda a: pl.BlockSpec(a.shape, lambda i: (0,) * a.ndim)  # VMEM-resident

    out_padded = pl.pallas_call(
        user_embedding_kernel,
        out_shape=jax.ShapeDtypeStruct((b_pad, Op), jnp.float32),
        grid=grid,
        in_specs=[
            pl.BlockSpec((tm, Kp), lambda i: (i, 0)),  # x: tiled over batch
            const(w1_p), const(b1_p),
            const(w2_p), const(b2_p),
            const(w3_p), const(b3_p),
        ],
        out_specs=pl.BlockSpec((tm, Op), lambda i: (i, 0)),  # lane-dense (Op=128k)
        compiler_params=pltpu.CompilerParams(
            dimension_semantics=("parallel",),
        ),
    )(x_p, w1_p, b1_p, w2_p, b2_p, w3_p, b3_p)

    return out_padded[:B, :out_size]


def init_params(key, input_size, hidden_size, output_size):
    """Deterministic init mimicking nn.Linear's uniform(-1/sqrt(fan_in), +1/sqrt(fan_in)).
    Weights stored as (in, out) — transposed vs. PyTorch's (out, in)."""
    ks = jax.random.split(key, 6)

    def linear(kw, kb, fan_in, fan_out):
        bound = 1.0 / jnp.sqrt(jnp.float32(fan_in))
        w = jax.random.uniform(kw, (fan_in, fan_out), jnp.float32, -bound, bound)
        b = jax.random.uniform(kb, (1, fan_out), jnp.float32, -bound, bound)
        return w, b

    w1, b1 = linear(ks[0], ks[1], input_size, hidden_size)
    w2, b2 = linear(ks[2], ks[3], hidden_size, hidden_size)
    w3, b3 = linear(ks[4], ks[5], hidden_size, output_size)
    return {"w1": w1, "b1": b1, "w2": w2, "b2": b2, "w3": w3, "b3": b3}


def _reference(x, params):
    h1 = jnp.tanh(x @ params["w1"] + params["b1"])
    h2 = jnp.tanh(h1 @ params["w2"] + params["b2"])
    return h2 @ params["w3"] + params["b3"]


if __name__ == "__main__":
    key = jax.random.PRNGKey(0)
    k_x, k_x2, k_p = jax.random.split(key, 3)

    batch, input_size, hidden_size, output_size = 8, 16, 32, 8
    x = jax.random.normal(k_x, (batch, input_size), jnp.float32)
    params = init_params(k_p, input_size, hidden_size, output_size)

    # 1) f32 path, single tile.
    out = jax.block_until_ready(user_embedding_forward(x, params))
    ref = _reference(x, params)
    assert out.shape == (batch, output_size)
    assert jnp.allclose(out, ref, atol=1e-5, rtol=1e-5)

    # 2) f32 path, ragged batch across multiple grid steps (forces tm=8, 5 tiles).
    batch2 = 37
    x2 = jax.random.normal(k_x2, (batch2, input_size), jnp.float32)
    out2 = jax.block_until_ready(user_embedding_forward(x2, params, tm_max=8))
    ref2 = _reference(x2, params)
    assert out2.shape == (batch2, output_size)
    assert jnp.allclose(out2, ref2, atol=1e-5, rtol=1e-5)

    # 3) bf16 MXU-operand path (f32 accumulate + f32 tanh), loose tolerance.
    out_bf16 = jax.block_until_ready(user_embedding_forward(x, params, use_bf16=True))
    assert out_bf16.shape == (batch, output_size)
    assert jnp.allclose(out_bf16, ref, atol=1e-1, rtol=0.0)

    print("KERNEL_OK")
</pallas_src>

<mosaic_0001>
module attributes {stable_mosaic.version = 11 : i64} {
  func.func @user_embedding_kernel(%arg0: i32, %arg1: memref<8x128xf32, #tpu.memory_space<vmem>>, %arg2: memref<128x128xf32, #tpu.memory_space<vmem>>, %arg3: memref<1x128xf32, #tpu.memory_space<vmem>>, %arg4: memref<128x128xf32, #tpu.memory_space<vmem>>, %arg5: memref<1x128xf32, #tpu.memory_space<vmem>>, %arg6: memref<128x128xf32, #tpu.memory_space<vmem>>, %arg7: memref<1x128xf32, #tpu.memory_space<vmem>>, %arg8: memref<8x128xf32, #tpu.memory_space<vmem>>) attributes {dimension_semantics = [#tpu.dimension_semantics<parallel>], iteration_bounds = array<i64: 1>, scalar_prefetch = 0 : i64, scratch_operands = 0 : i64, tpu.core_type = #tpu.core_type<tc>, window_params = [{transform_indices = @transform_0, window_bounds = array<i64: 8, 128>}, {pipeline_mode = #tpu.pipeline_mode<synchronous>, transform_indices = @transform_1, window_bounds = array<i64: 128, 128>}, {pipeline_mode = #tpu.pipeline_mode<synchronous>, transform_indices = @transform_2, window_bounds = array<i64: 1, 128>}, {pipeline_mode = #tpu.pipeline_mode<synchronous>, transform_indices = @transform_3, window_bounds = array<i64: 128, 128>}, {pipeline_mode = #tpu.pipeline_mode<synchronous>, transform_indices = @transform_4, window_bounds = array<i64: 1, 128>}, {pipeline_mode = #tpu.pipeline_mode<synchronous>, transform_indices = @transform_5, window_bounds = array<i64: 128, 128>}, {pipeline_mode = #tpu.pipeline_mode<synchronous>, transform_indices = @transform_6, window_bounds = array<i64: 1, 128>}, {transform_indices = @transform_7, window_bounds = array<i64: 8, 128>}]} {
    %c0 = arith.constant 0 : index
    %c0_0 = arith.constant 0 : index
    %0 = vector.load %arg1[%c0, %c0_0] : memref<8x128xf32, #tpu.memory_space<vmem>>, vector<8x128xf32>
    %c0_1 = arith.constant 0 : index
    %c0_2 = arith.constant 0 : index
    %1 = vector.load %arg2[%c0_1, %c0_2] : memref<128x128xf32, #tpu.memory_space<vmem>>, vector<128x128xf32>
    %cst = arith.constant dense<0.000000e+00> : vector<8x128xf32>
    %2 = tpu.matmul %0, %1, %cst {dimension_numbers = #tpu.dot_dimension_numbers<[1], [0], [0], [1], [0, 0, 1, 1], [], []>} : vector<8x128xf32>, vector<128x128xf32>, vector<8x128xf32> -> vector<8x128xf32>
    %c0_3 = arith.constant 0 : index
    %c0_4 = arith.constant 0 : index
    %3 = vector.load %arg3[%c0_3, %c0_4] : memref<1x128xf32, #tpu.memory_space<vmem>>, vector<1x128xf32>
    %4 = vector.broadcast %3 : vector<1x128xf32> to vector<8x128xf32>
    %5 = arith.addf %2, %4 : vector<8x128xf32>
    %6 = math.tanh %5 : vector<8x128xf32>
    %c0_5 = arith.constant 0 : index
    %c0_6 = arith.constant 0 : index
    %7 = vector.load %arg4[%c0_5, %c0_6] : memref<128x128xf32, #tpu.memory_space<vmem>>, vector<128x128xf32>
    %cst_7 = arith.constant dense<0.000000e+00> : vector<8x128xf32>
    %8 = tpu.matmul %6, %7, %cst_7 {dimension_numbers = #tpu.dot_dimension_numbers<[1], [0], [0], [1], [0, 0, 1, 1], [], []>} : vector<8x128xf32>, vector<128x128xf32>, vector<8x128xf32> -> vector<8x128xf32>
    %c0_8 = arith.constant 0 : index
    %c0_9 = arith.constant 0 : index
    %9 = vector.load %arg5[%c0_8, %c0_9] : memref<1x128xf32, #tpu.memory_space<vmem>>, vector<1x128xf32>
    %10 = vector.broadcast %9 : vector<1x128xf32> to vector<8x128xf32>
    %11 = arith.addf %8, %10 : vector<8x128xf32>
    %12 = math.tanh %11 : vector<8x128xf32>
    %c0_10 = arith.constant 0 : index
    %c0_11 = arith.constant 0 : index
    %13 = vector.load %arg6[%c0_10, %c0_11] : memref<128x128xf32, #tpu.memory_space<vmem>>, vector<128x128xf32>
    %cst_12 = arith.constant dense<0.000000e+00> : vector<8x128xf32>
    %14 = tpu.matmul %12, %13, %cst_12 {dimension_numbers = #tpu.dot_dimension_numbers<[1], [0], [0], [1], [0, 0, 1, 1], [], []>} : vector<8x128xf32>, vector<128x128xf32>, vector<8x128xf32> -> vector<8x128xf32>
    %c0_13 = arith.constant 0 : index
    %c0_14 = arith.constant 0 : index
    %15 = vector.load %arg7[%c0_13, %c0_14] : memref<1x128xf32, #tpu.memory_space<vmem>>, vector<1x128xf32>
    %16 = vector.broadcast %15 : vector<1x128xf32> to vector<8x128xf32>
    %17 = arith.addf %14, %16 : vector<8x128xf32>
    %c0_15 = arith.constant 0 : index
    %c0_16 = arith.constant 0 : index
    %18 = vector.load %arg8[%c0_15, %c0_16] : memref<8x128xf32, #tpu.memory_space<vmem>>, vector<8x128xf32>
    tpu.vector_store %arg8[%c0_15, %c0_16], %17 {strides = array<i32>} : memref<8x128xf32, #tpu.memory_space<vmem>>, vector<8x128xf32>,
    return
  }
  func.func @transform_0(%arg0: i32) -> (i32, i32) {
    %c0_i32 = arith.constant 0 : i32
    %c0_i32_0 = arith.constant 0 : i32
    return %arg0, %c0_i32 : i32, i32
  }
  func.func @transform_1(%arg0: i32) -> (i32, i32) {
    %c0_i32 = arith.constant 0 : i32
    %c0_i32_0 = arith.constant 0 : i32
    %c0_i32_1 = arith.constant 0 : i32
    return %c0_i32, %c0_i32_0 : i32, i32
  }
  func.func @transform_2(%arg0: i32) -> (i32, i32) {
    %c0_i32 = arith.constant 0 : i32
    %c0_i32_0 = arith.constant 0 : i32
    %c0_i32_1 = arith.constant 0 : i32
    return %c0_i32, %c0_i32_0 : i32, i32
  }
  func.func @transform_3(%arg0: i32) -> (i32, i32) {
    %c0_i32 = arith.constant 0 : i32
    %c0_i32_0 = arith.constant 0 : i32
    %c0_i32_1 = arith.constant 0 : i32
    return %c0_i32, %c0_i32_0 : i32, i32
  }
  func.func @transform_4(%arg0: i32) -> (i32, i32) {
    %c0_i32 = arith.constant 0 : i32
    %c0_i32_0 = arith.constant 0 : i32
    %c0_i32_1 = arith.constant 0 : i32
    return %c0_i32, %c0_i32_0 : i32, i32
  }
  func.func @transform_5(%arg0: i32) -> (i32, i32) {
    %c0_i32 = arith.constant 0 : i32
    %c0_i32_0 = arith.constant 0 : i32
    %c0_i32_1 = arith.constant 0 : i32
    return %c0_i32, %c0_i32_0 : i32, i32
  }
  func.func @transform_6(%arg0: i32) -> (i32, i32) {
    %c0_i32 = arith.constant 0 : i32
    %c0_i32_0 = arith.constant 0 : i32
    %c0_i32_1 = arith.constant 0 : i32
    return %c0_i32, %c0_i32_0 : i32, i32
  }
  func.func @transform_7(%arg0: i32) -> (i32, i32) {
    %c0_i32 = arith.constant 0 : i32
    %c0_i32_0 = arith.constant 0 : i32
    return %arg0, %c0_i32 : i32, i32
  }
}

</mosaic_0001>

<bundles_post_ra>
// kernel: tpu_custom_call.1
= control target key start
LH: loop header
LB: loop body
LE: loop exit
PB: predicated region body
PF: predicated region fallthrough
CT: control target
= control target key end

     0   :  { %12 = vsyncpa [#allocation3], 0  ;;  %s444_s0 = inlined_call_operand.hbm [shape: f32[8,128], index: 0, kind: input, shape index: {}]   ;;  %s445_s1 = inlined_call_operand.hbm [shape: f32[128,128], index: 1, kind: input, shape index: {}]   ;;  %s446_s2 = inlined_call_operand.vmem [shape: f32[1,128], index: 2, kind: input, shape index: {}]   ;;  %s447_s3 = inlined_call_operand.hbm [shape: f32[128,128], index: 3, kind: input, shape index: {}]   ;;  %s448_s4 = inlined_call_operand.vmem [shape: f32[1,128], index: 4, kind: input, shape index: {}]   ;;  %s449_s5 = inlined_call_operand.hbm [shape: f32[128,128], index: 5, kind: input, shape index: {}]   ;;  %s450_s6 = inlined_call_operand.vmem [shape: f32[1,128], index: 6, kind: input, shape index: {}]   ;;  %s451_s7 = inlined_call_operand.hbm [shape: f32[8,128], index: 7, kind: output, shape index: {}]  }
   0x1   :  { %13 = vsyncpa [#allocation6], 0 }
   0x2   :  { %14 = vsyncpa [#allocation9], 0  ;;  %s31_s26 = sshll.u32 %s445_s1, 4  ;;  %s32_s26 = int_to_ptr.hbm [resolvable:$true] %s31_s26 }
   0x3   :  { %15 = vsyncpa [#allocation4], 0  ;;  %s373_s27 = smov [#allocation5]   ;;  %s21_s8 = sshll.u32 %s444_s0, 4  ;;  %s22_s8 = int_to_ptr.hbm [resolvable:$true] %s21_s8 }
   0x4   :  { %s33_s28 = sshll.u32 %s373_s27, 4  ;;  %s374_s9 = smov 128   ;;  %s34_s28 = int_to_ptr.vmem [resolvable:$true] %s33_s28 }
   0x5   :  { %s375_s10 = smov 8   ;;  %s376_s11 = smov [#allocation2]  }
   0x6   :  { %39 = dma.hbm_to_vmem [thread:$0]  %s32_s26, 2048, %s34_s28, [#allocation6], %s374_s9, %s374_s9, %s375_s10  }
   0x7   :  { %s23_s12 = sshll.u32 %s376_s11, 4  ;;  %s46_s15 = sshll.u32 %s447_s3, 4  ;;  %s24_s12 = int_to_ptr.vmem [resolvable:$true] %s23_s12  ;;  %s47_s15 = int_to_ptr.hbm [resolvable:$true] %s46_s15 }
   0x8   :  { %26 = dma.hbm_to_vmem [thread:$0]  %s22_s8, 128, %s24_s12, [#allocation3]  }
   0x9   :  { %s61_s17 = sshll.u32 %s449_s5, 4  ;;  %s377_s18 = smov [#allocation7]   ;;  %s62_s17 = int_to_ptr.hbm [resolvable:$true] %s61_s17 }
   0xa   :  { %s48_s19 = sshll.u32 %s377_s18, 4  ;;  %s378_s0 = smov [#allocation8]   ;;  %s49_s19 = int_to_ptr.vmem [resolvable:$true] %s48_s19 }
   0xb   :  { %54 = dma.hbm_to_vmem [thread:$0]  %s47_s15, 2048, %s49_s19, [#allocation6], %s374_s9, %s374_s9, %s375_s10  }
   0xc   :  { %s63_s20 = sshll.u32 %s378_s0, 4  ;;  %s64_s20 = int_to_ptr.vmem [resolvable:$true] %s63_s20 }
   0xd   :  { %69 = dma.hbm_to_vmem [thread:$0]  %s62_s17, 2048, %s64_s20, [#allocation9], %s374_s9, %s374_s9, %s375_s10  }
   0xe   :  { %365 = dma.done.wait [#allocation3], 128  }
   0xf   :  { %366 = vsyncadd [#allocation3], 4294967168 }
  0x10   :  { %367 = dma.done.wait [#allocation6], 4096  }
  0x11   :  { %368 = vsyncadd [#allocation6], 4294963200 }
  0x12   :  { %369 = dma.done.wait [#allocation9], 2048  }
  0x13   :  { %370 = vsyncadd [#allocation9], 4294965248  ;;  %v104_v0 = vld [vmem:[#allocation5 + $0x78] sm:$0xff]  ;;  %v103_v1 = vld [vmem:[#allocation5 + $0x70] sm:$0xff]  ;;  %s379_s24 = smov [#allocation10]   ;;  %s219_s28 = sshll.u32 %s451_s7, 4  ;;  %s220_s28 = int_to_ptr.hbm [resolvable:$true] %s219_s28 }
  0x14   :  { %109 = vmatpush.msra.mxu0 %v104_v0  ;;  %v102_v2 = vld [vmem:[#allocation5 + $0x68] sm:$0xff]  ;;  %v101_v3 = vld [vmem:[#allocation5 + $0x60] sm:$0xff]  ;;  %v145_v4 = vld [vmem:[#allocation7 + $0x78] sm:$0xff]  ;;  %s217_s25 = sshll.u32 %s379_s24, 4  ;;  %s218_s25 = int_to_ptr.vmem [resolvable:$true] %s217_s25 }
  0x15   :  { %v100_v5 = vld [vmem:[#allocation5 + $0x58] sm:$0xff]  ;;  %150 = vmatpush.msra.mxu1 %v145_v4  ;;  %v144_v6 = vld [vmem:[#allocation7 + $0x70] sm:$0xff]  ;;  %v143_v7 = vld [vmem:[#allocation7 + $0x68] sm:$0xff] }
  0x16   :  { %110 = vmatpush.msra.mxu0 %v103_v1  ;;  %v99_v8 = vld [vmem:[#allocation5 + $0x50] sm:$0xff]  ;;  %v142_v9 = vld [vmem:[#allocation7 + $0x60] sm:$0xff]  ;;  %v98_v10 = vld [vmem:[#allocation5 + $0x48] sm:$0xff] }
  0x17   :  { %151 = vmatpush.msra.mxu1 %v144_v6  ;;  %v141_v11 = vld [vmem:[#allocation7 + $0x58] sm:$0xff]  ;;  %v97_v12 = vld [vmem:[#allocation5 + $0x40] sm:$0xff]  ;;  %v140_v13 = vld [vmem:[#allocation7 + $0x50] sm:$0xff] }
  0x18   :  { %111 = vmatpush.msra.mxu0 %v102_v2  ;;  %v96_v14 = vld [vmem:[#allocation5 + $0x38] sm:$0xff]  ;;  %v139_v15 = vld [vmem:[#allocation7 + $0x48] sm:$0xff]  ;;  %v95_v16 = vld [vmem:[#allocation5 + $0x30] sm:$0xff] }
  0x19   :  { %152 = vmatpush.msra.mxu1 %v143_v7  ;;  %v138_v17 = vld [vmem:[#allocation7 + $0x40] sm:$0xff]  ;;  %v94_v18 = vld [vmem:[#allocation5 + $0x28] sm:$0xff]  ;;  %v137_v19 = vld [vmem:[#allocation7 + $0x38] sm:$0xff] }
  0x1a   :  { %112 = vmatpush.msra.mxu0 %v101_v3  ;;  %v93_v20 = vld [vmem:[#allocation5 + $0x20] sm:$0xff]  ;;  %v136_v21 = vld [vmem:[#allocation7 + $0x30] sm:$0xff]  ;;  %v92_v22 = vld [vmem:[#allocation5 + $0x18] sm:$0xff] }
  0x1b   :  { %153 = vmatpush.msra.mxu1 %v142_v9  ;;  %v135_v23 = vld [vmem:[#allocation7 + $0x28] sm:$0xff]  ;;  %v91_v24 = vld [vmem:[#allocation5 + $0x10] sm:$0xff]  ;;  %v89_v26 = vld [vmem:[#allocation5] sm:$0xff] }
  0x1c   :  { %113 = vmatpush.msra.mxu0 %v100_v5  ;;  %v90_v25 = vld [vmem:[#allocation5 + $0x8] sm:$0xff]  ;;  %v88_v27 = vld [vmem:[#allocation2] sm:$0xff]  ;;  %v134_v28 = vld [vmem:[#allocation7 + $0x20] sm:$0xff] }
  0x1d   :  { %154 = vmatpush.msra.mxu1 %v141_v11  ;;  %v133_v29 = vld [vmem:[#allocation7 + $0x18] sm:$0xff]  ;;  %v132_v30 = vld [vmem:[#allocation7 + $0x10] sm:$0xff]  ;;  %v131_v31 = vld [vmem:[#allocation7 + $0x8] sm:$0xff] }
  0x1e   :  { %114 = vmatpush.msra.mxu0 %v99_v8  ;;  %v130_v32 = vld [vmem:[#allocation7] sm:$0xff]  ;;  %v186_v33 = vld [vmem:[#allocation8 + $0x78] sm:$0xff]  ;;  %v185_v34 = vld [vmem:[#allocation8 + $0x70] sm:$0xff] }
  0x1f   :  { %155 = vmatpush.msra.mxu1 %v140_v13  ;;  %191 = vmatpush.msra.mxu2 %v186_v33  ;;  %v184_v35 = vld [vmem:[#allocation8 + $0x68] sm:$0xff]  ;;  %v183_v36 = vld [vmem:[#allocation8 + $0x60] sm:$0xff]  ;;  %v182_v37 = vld [vmem:[#allocation8 + $0x58] sm:$0xff] }
  0x20   :  { %115 = vmatpush.msra.mxu0 %v98_v10  ;;  %v181_v38 = vld [vmem:[#allocation8 + $0x50] sm:$0xff]  ;;  %v180_v39 = vld [vmem:[#allocation8 + $0x48] sm:$0xff]  ;;  %v179_v40 = vld [vmem:[#allocation8 + $0x40] sm:$0xff] }
  0x21   :  { %156 = vmatpush.msra.mxu1 %v139_v15  ;;  %192 = vmatpush.msra.mxu2 %v185_v34  ;;  %v178_v41 = vld [vmem:[#allocation8 + $0x38] sm:$0xff]  ;;  %v177_v42 = vld [vmem:[#allocation8 + $0x30] sm:$0xff]  ;;  %v176_v43 = vld [vmem:[#allocation8 + $0x28] sm:$0xff] }
  0x22   :  { %116 = vmatpush.msra.mxu0 %v97_v12  ;;  %v238_v44 = vld [vmem:[%s446_s2] ss:$0 sm:$0xff]  ;;  %v175_v48 = vld [vmem:[#allocation8 + $0x20] sm:$0xff]  ;;  %v173_v50 = vld [vmem:[#allocation8 + $0x10] sm:$0xff] }
  0x23   :  { %157 = vmatpush.msra.mxu1 %v138_v17  ;;  %193 = vmatpush.msra.mxu2 %v184_v35  ;;  %v174_v49 = vld [vmem:[#allocation8 + $0x18] sm:$0xff]  ;;  %v172_v51 = vld [vmem:[#allocation8 + $0x8] sm:$0xff]  ;;  %v171_v52 = vld [vmem:[#allocation8] sm:$0xff] }
  0x24   :  { %117 = vmatpush.msra.mxu0 %v96_v14  ;;  %v239_v53 = vld [vmem:[%s448_s4] ss:$0 sm:$0xff] }
  0x25   :  { %158 = vmatpush.msra.mxu1 %v137_v19  ;;  %194 = vmatpush.msra.mxu2 %v183_v36  ;;  %v240_v57 = vld [vmem:[%s450_s6] ss:$0 sm:$0xff] }
  0x26   :  { %118 = vmatpush.msra.mxu0 %v95_v16 }
  0x27   :  { %159 = vmatpush.msra.mxu1 %v136_v21  ;;  %195 = vmatpush.msra.mxu2 %v182_v37 }
  0x28   :  { %119 = vmatpush.msra.mxu0 %v94_v18 }
  0x29   :  { %160 = vmatpush.msra.mxu1 %v135_v23  ;;  %196 = vmatpush.msra.mxu2 %v181_v38 }
  0x2a   :  { %120 = vmatpush.msra.mxu0 %v93_v20 }
  0x2b   :  { %161 = vmatpush.msra.mxu1 %v134_v28  ;;  %197 = vmatpush.msra.mxu2 %v180_v39 }
  0x2c   :  { %121 = vmatpush.msra.mxu0 %v92_v22 }
  0x2d   :  { %162 = vmatpush.msra.mxu1 %v133_v29  ;;  %198 = vmatpush.msra.mxu2 %v179_v40 }
  0x2e   :  { %122 = vmatpush.msra.mxu0 %v91_v24 }
  0x2f   :  { %163 = vmatpush.msra.mxu1 %v132_v30  ;;  %199 = vmatpush.msra.mxu2 %v178_v41 }
  0x30   :  { %123 = vmatpush.msra.mxu0 %v90_v25 }
  0x31   :  { %164 = vmatpush.msra.mxu1 %v131_v31  ;;  %200 = vmatpush.msra.mxu2 %v177_v42 }
  0x32   :  { %124 = vmatpush.msra.mxu0 %v89_v26 }
  0x33   :  { %125 = vmatmul.f32.vlgmr.msra.gmra.mxu0 %v88_v27  ;;  %165 = vmatpush.msra.mxu1 %v130_v32 }
  0x34   :  { %201 = vmatpush.msra.mxu2 %v176_v43 }
  0x36   :  { %202 = vmatpush.msra.mxu2 %v175_v48 }
  0x38   :  { %203 = vmatpush.msra.mxu2 %v174_v49 }
  0x3a   :  { %204 = vmatpush.msra.mxu2 %v173_v50 }
  0x3c   :  { %205 = vmatpush.msra.mxu2 %v172_v51 }
  0x3e   :  { %206 = vmatpush.msra.mxu2 %v171_v52 }
  0xb0   :  { %v126_v45 = vpop.f32.mrf.mxu0 }
  0xb1   :  { %v127_v46 = vadd.f32 %v238_v44, %v126_v45 }
  0xb3   :  { %241 = vtanh.f32 %v127_v46 }
  0xb9   :  { %v242_v47 = vpop.eup %241 }
  0xba   :  { %166 = vmatmul.f32.vlgmr.msra.gmra.mxu1 %v242_v47 }
 0x137   :  { %v167_v54 = vpop.f32.mrf.mxu1 }
 0x138   :  { %v168_v55 = vadd.f32 %v239_v53, %v167_v54 }
 0x13a   :  { %243 = vtanh.f32 %v168_v55 }
 0x140   :  { %v244_v56 = vpop.eup %243 }
 0x141   :  { %207 = vmatmul.f32.vlgmr.msra.gmra.mxu2 %v244_v56 }
 0x1c4   :  { %v208_v58 = vpop.f32.mrf.mxu2 }
 0x1c5   :  { %v209_v59 = vadd.f32 %v240_v57, %v208_v58 }
 0x1c7   :  { %211 = vst [vmem:[#allocation10] sm:$0xff] %v209_v59 }
 0x1c8   :  { %222 = dma.vmem_to_hbm [thread:$0]  %s218_s25, 128, %s220_s28, [#allocation4]  }
 0x1c9   :  { %371 = dma.done.wait [#allocation4], 128  }
 0x1ca   :  { %372 = vsyncadd [#allocation4], 4294967168 }
 0x1cb   :  { %227 = vsyncpa [#allocation3], 1 }
 0x1cc   :  { %228 = vsyncpa [#allocation6], 1 }
 0x1cd   :  { %229 = vsyncpa [#allocation9], 1 }
 0x1ce   :  { %230 = vsyncpa [#allocation4], 1 }

</bundles_post_ra>
